<compile_context>
chip_gen: v6e
topology: v6e:2x2x1
jax: 0.10.0
libtpu: 0.0.40
codegen_flags: <defaults>
</compile_context>

<pallas_src>
import functools
import math

import numpy as np

import jax
import jax.numpy as jnp
from jax import lax
from jax.experimental import pallas as pl
from jax.experimental.pallas import tpu as pltpu


_F32 = 4
_HEADROOM = 4 << 20


def _round_up(x, m):
    return ((x + m - 1) // m) * m


def _vmem_capacity_bytes():
    try:
        return int(pltpu.get_tpu_info().vmem_capacity_bytes)
    except Exception:
        return 64 << 20  # conservative fallback (v7x per-TC capacity)


def _kernel_vmem_bytes(tb, h, w, lp, mp):
    """Rough per-step VMEM footprint (DMA buffers + live in-kernel values)."""
    xb = tb * h * w * _F32                 # input block (double buffered)
    ob = tb * lp * 2 * mp * _F32           # output block (double buffered)
    wfb = w * 2 * mp * _F32                # W-axis DFT matrix (single buffered)
    hfb = 2 * lp * h * _F32                # H-axis DFT matrix (single buffered)
    zb = h * 2 * mp * _F32                 # per-slice [Xr | Xi]
    hbb = 2 * lp * 2 * mp * _F32           # per-slice [A;S] @ [Xr | Xi]
    yb = 2 * lp * mp * _F32                # yr / yi temporaries
    vals = wfb + hfb + h * w * _F32        # matmul operands held as (spilled) values
    return 2 * (xb + ob) + wfb + hfb + zb + hbb + yb + vals


def _pick_tb(n_slices, h, w, lp, mp, vmem_cap, max_tb=8):
    """Largest slice batch per grid step that fits the VMEM budget, preferring
    an even grid extent >= 4 (prefetch/writeback overlap + both TCs on v7x)."""
    budget = vmem_cap - _HEADROOM
    cands = [tb for tb in range(1, min(max_tb, n_slices) + 1)
             if n_slices % tb == 0
             and _kernel_vmem_bytes(tb, h, w, lp, mp) <= budget]
    if not cands:
        return 1

    def score(tb):
        g = n_slices // tb
        return (g >= 4, g % 2 == 0, tb)

    return max(cands, key=score)


def _fused_dft_matrices(nlat, nlon, m_main, mp, lp):
    """Fused real/imag DFT matrices for ortho rfft (W axis) and fft (H axis).

    wf: [W, 2*mp]   cols [0, m_main)      = cos(2*pi*n*k/W)/sqrt(W)
                    cols [mp, mp+m_main)  = -sin(2*pi*n*k/W)/sqrt(W)
    hf: [2*lp, H]   rows [0, nlat)        = cos(2*pi*l*h/H)/sqrt(H)
                    rows [lp, lp+nlat)    = sin(2*pi*l*h/H)/sqrt(H)
    Padding rows/cols are zero.  Phases are reduced mod N in int64 and the trig
    is evaluated in float64 (no int32 overflow, no f32 phase rounding).
    """
    n = np.arange(nlon, dtype=np.int64)[:, None]
    k = np.arange(m_main, dtype=np.int64)[None, :]
    ph_w = ((n * k) % nlon).astype(np.float64) * (2.0 * math.pi / nlon)
    sw = 1.0 / math.sqrt(nlon)
    wf = np.zeros((nlon, 2 * mp), np.float32)
    wf[:, :m_main] = (np.cos(ph_w) * sw).astype(np.float32)
    wf[:, mp:mp + m_main] = (-np.sin(ph_w) * sw).astype(np.float32)

    l = np.arange(nlat, dtype=np.int64)[:, None]
    h = np.arange(nlat, dtype=np.int64)[None, :]
    ph_h = ((l * h) % nlat).astype(np.float64) * (2.0 * math.pi / nlat)
    sh = 1.0 / math.sqrt(nlat)
    hf = np.zeros((2 * lp, nlat), np.float32)
    hf[:nlat, :] = (np.cos(ph_h) * sh).astype(np.float32)
    hf[lp:lp + nlat, :] = (np.sin(ph_h) * sh).astype(np.float32)
    return jnp.asarray(wf), jnp.asarray(hf)


def _fft2_kernel(x_ref, wf_ref, hf_ref, out_ref, *, tb, lp, mp):
    # x_ref: (tb, H, W); wf_ref: (W, 2*mp) = [cos | -sin]/sqrt(W)
    # hf_ref: (2*lp, H) = [cos ; sin]/sqrt(H); out_ref: (tb, lp, 2*mp) = [yr | yi]
    wf = wf_ref[...]
    hf = hf_ref[...]

    def body(b, carry):
        # W-axis rfft (fused real/imag): z = x[b] @ [cos | -sin] -> [Xr | Xi]
        z = jnp.dot(x_ref[b], wf,
                    preferred_element_type=jnp.float32,
                    precision=lax.Precision.HIGHEST)
        # H-axis fft: hb = [A ; S] @ [Xr | Xi] -> (2*lp, 2*mp)
        hb = jnp.dot(hf, z,
                     preferred_element_type=jnp.float32,
                     precision=lax.Precision.HIGHEST)
        # Yr = A@Xr + S@Xi ; Yi = A@Xi - S@Xr.  Both stores are lane-aligned
        # (mp is a multiple of 128) -> unmasked vst, no concatenate temporary.
        out_ref[b, :, :mp] = hb[:lp, :mp] + hb[lp:, mp:]
        out_ref[b, :, mp:] = hb[:lp, mp:] - hb[lp:, :mp]
        return carry

    lax.fori_loop(0, tb, body, 0)


class DistributedRealFFT2:
    """Single-device (comm_size_h = comm_size_w = 1) port of the PyTorch module.

    Forward = rfft(W, ortho) -> slice to mmax -> fft(H, ortho), emitted by one
    MXU-bound Pallas kernel as a lane-dense f32 [yr | yi] slab.
    """

    def __init__(self, nlat, nlon, lmax=None, mmax=None):
        self.comm_size_h = 1
        self.comm_size_w = 1
        self.nlat = nlat
        self.nlon = nlon
        self.lmax = lmax or nlat
        self.mmax = mmax or nlon // 2 + 1
        ldist = (self.lmax + self.comm_size_h - 1) // self.comm_size_h
        self.lpad = ldist * self.comm_size_h - self.lmax    # == 0 for size 1
        mdist = (self.mmax + self.comm_size_w - 1) // self.comm_size_w
        self.mpad = mdist * self.comm_size_w - self.mmax    # == 0 for size 1

        # When nlon/2 is already lane aligned, keep the kernel at nlon/2 output
        # columns and fix up the single Nyquist column in the wrapper instead
        # of padding mmax up to the next multiple of 128 (dead MXU lanes).
        self._split_nyquist = (
            nlon % 2 == 0
            and self.mmax == nlon // 2 + 1
            and (nlon // 2) % 128 == 0)
        self.m_main = nlon // 2 if self._split_nyquist else self.mmax

        self.Mp = _round_up(self.m_main, 128)   # lane-dense output columns
        self.Lp = _round_up(self.nlat, 8)       # sublane-aligned output rows
        self._wf, self._hf = _fused_dft_matrices(
            self.nlat, self.nlon, self.m_main, self.Mp, self.Lp)

        if self._split_nyquist:
            sign = np.where(np.arange(nlon) % 2 == 0, 1.0, -1.0) / math.sqrt(nlon)
            self._nyq_w = jnp.asarray(sign.astype(np.float32))
            l = np.arange(nlat, dtype=np.int64)[:, None]
            h = np.arange(nlat, dtype=np.int64)[None, :]
            ph = ((l * h) % nlat).astype(np.float64) * (2.0 * math.pi / nlat)
            fh = (np.cos(ph) - 1j * np.sin(ph)) / math.sqrt(nlat)
            self._nyq_h = jnp.asarray(fh.astype(np.complex64))

    def __call__(self, x):
        assert x.shape[1] % self.comm_size_h == 0
        assert x.shape[1] % self.comm_size_w == 0
        B, C, H, W = x.shape
        assert H == self.nlat and W == self.nlon
        Lp, Mp = self.Lp, self.Mp

        n_slices = B * C
        vmem_cap = _vmem_capacity_bytes()
        tb = _pick_tb(n_slices, H, W, Lp, Mp, vmem_cap)
        grid = (n_slices // tb,)
        vmem_limit = int(min(
            vmem_cap,
            max(_kernel_vmem_bytes(tb, H, W, Lp, Mp) + _HEADROOM, 32 << 20)))

        xf = x.reshape(n_slices, H, W).astype(jnp.float32)

        flops = n_slices * (2 * H * W * 2 * Mp + 2 * (2 * Lp) * H * 2 * Mp)
        bytes_accessed = (xf.size + n_slices * Lp * 2 * Mp
                          + self._wf.size + self._hf.size) * _F32

        kernel = functools.partial(_fft2_kernel, tb=tb, lp=Lp, mp=Mp)

        # Constant DFT matrices: constant index_map + single-buffered (no point
        # double-buffering operands that are never re-fetched).
        wf_spec = pl.BlockSpec((W, 2 * Mp), lambda i: (0, 0),
                               pipeline_mode=pl.Buffered(1))
        hf_spec = pl.BlockSpec((2 * Lp, H), lambda i: (0, 0),
                               pipeline_mode=pl.Buffered(1))

        out = pl.pallas_call(
            kernel,
            out_shape=jax.ShapeDtypeStruct((n_slices, Lp, 2 * Mp), jnp.float32),
            grid_spec=pltpu.PrefetchScalarGridSpec(
                num_scalar_prefetch=0,
                grid=grid,
                in_specs=[
                    pl.BlockSpec((tb, H, W), lambda i: (i, 0, 0)),
                    wf_spec,
                    hf_spec,
                ],
                out_specs=pl.BlockSpec((tb, Lp, 2 * Mp), lambda i: (i, 0, 0)),
            ),
            compiler_params=pltpu.CompilerParams(
                dimension_semantics=("parallel",),
                vmem_limit_bytes=vmem_limit),
            cost_estimate=pl.CostEstimate(
                flops=int(flops), transcendentals=0,
                bytes_accessed=int(bytes_accessed)),
        )(xf, self._wf, self._hf)

        yr = out[:, :self.nlat, :self.m_main]
        yi = out[:, :self.nlat, Mp:Mp + self.m_main]
        y = lax.complex(yr, yi).reshape(B, C, self.nlat, self.m_main)

        if self._split_nyquist:
            # Lone Nyquist column (k = nlon/2): its rfft value is real; its
            # H-axis ortho fft is a tiny complex matvec per (b, c) slice.
            x_nyq = jnp.einsum('bchw,w->bch', x.astype(jnp.float32), self._nyq_w,
                               precision=lax.Precision.HIGHEST)
            y_nyq = jnp.einsum('lh,bch->bcl', self._nyq_h,
                               x_nyq.astype(jnp.complex64),
                               precision=lax.Precision.HIGHEST)
            y = jnp.concatenate([y, y_nyq[..., None]], axis=-1)

        # F.pad equivalents (zero width for comm size 1, kept for fidelity).
        if self.mpad or self.lpad:
            y = jnp.pad(y, ((0, 0), (0, 0), (0, self.lpad), (0, self.mpad)))
        return y


if __name__ == "__main__":
    def _reference(x, mmax, nlat, nlon):
        return jnp.fft.fft(
            jnp.fft.rfft(x, n=nlon, axis=-1, norm="ortho")[..., :mmax],
            n=nlat, axis=-2, norm="ortho")

    # Primary small case.
    B, C, nlat, nlon = 2, 4, 16, 16
    x = jax.random.normal(jax.random.PRNGKey(0), (B, C, nlat, nlon),
                          dtype=jnp.float32)
    mod = DistributedRealFFT2(nlat, nlon)
    y = jax.block_until_ready(mod(x))
    ref = _reference(x, mod.mmax, nlat, nlon)
    assert y.shape == (B, C, nlat + mod.lpad, mod.mmax + mod.mpad)
    assert jnp.allclose(y.real, ref.real, atol=1e-4, rtol=1e-4)
    assert jnp.allclose(y.imag, ref.imag, atol=1e-4, rtol=1e-4)

    # Secondary small case exercising the lane-aligned Nyquist-split path.
    B2, C2, nlat2, nlon2 = 1, 2, 32, 256
    x2 = jax.random.normal(jax.random.PRNGKey(0), (B2, C2, nlat2, nlon2),
                           dtype=jnp.float32)
    mod2 = DistributedRealFFT2(nlat2, nlon2)
    y2 = jax.block_until_ready(mod2(x2))
    ref2 = _reference(x2, mod2.mmax, nlat2, nlon2)
    assert y2.shape == (B2, C2, nlat2 + mod2.lpad, mod2.mmax + mod2.mpad)
    assert jnp.allclose(y2.real, ref2.real, atol=1e-4, rtol=1e-4)
    assert jnp.allclose(y2.imag, ref2.imag, atol=1e-4, rtol=1e-4)

    print("KERNEL_OK")
</pallas_src>

<mosaic_0001>
module attributes {stable_mosaic.version = 11 : i64} {
  func.func @_fft2_kernel(%arg0: i32, %arg1: memref<2x16x16xf32, #tpu.memory_space<vmem>>, %arg2: memref<16x256xf32, #tpu.memory_space<vmem>>, %arg3: memref<32x16xf32, #tpu.memory_space<vmem>>, %arg4: memref<2x16x256xf32, #tpu.memory_space<vmem>>) attributes {dimension_semantics = [#tpu.dimension_semantics<parallel>], iteration_bounds = array<i64: 4>, scalar_prefetch = 0 : i64, scratch_operands = 0 : i64, tpu.core_type = #tpu.core_type<tc>, window_params = [{transform_indices = @transform_0, window_bounds = array<i64: 2, 16, 16>}, {pipeline_mode = #tpu.pipeline_mode<synchronous>, transform_indices = @transform_1, window_bounds = array<i64: 16, 256>}, {pipeline_mode = #tpu.pipeline_mode<synchronous>, transform_indices = @transform_2, window_bounds = array<i64: 32, 16>}, {transform_indices = @transform_3, window_bounds = array<i64: 2, 16, 256>}]} {
    %c0 = arith.constant 0 : index
    %c0_0 = arith.constant 0 : index
    %0 = vector.load %arg2[%c0, %c0_0] : memref<16x256xf32, #tpu.memory_space<vmem>>, vector<16x256xf32>
    %c0_1 = arith.constant 0 : index
    %c0_2 = arith.constant 0 : index
    %1 = vector.load %arg3[%c0_1, %c0_2] : memref<32x16xf32, #tpu.memory_space<vmem>>, vector<32x16xf32>
    %c0_i32 = arith.constant 0 : i32
    %c2_i32 = arith.constant 2 : i32
    %2 = arith.addi %c0_i32, %c2_i32 : i32
    %c1_i32 = arith.constant 1 : i32
    scf.for %arg5 = %c0_i32 to %2 step %c1_i32  : i32 {
      %3 = arith.index_cast %arg5 : i32 to index
      %c0_4 = arith.constant 0 : index
      %c0_5 = arith.constant 0 : index
      %4 = vector.load %arg1[%3, %c0_4, %c0_5] : memref<2x16x16xf32, #tpu.memory_space<vmem>>, vector<1x16x16xf32>
      %5 = vector.shape_cast %4 : vector<1x16x16xf32> to vector<16x16xf32>
      %cst = arith.constant dense<0.000000e+00> : vector<16x256xf32>
      %6 = tpu.matmul %5, %0, %cst {dimension_numbers = #tpu.dot_dimension_numbers<[1], [0], [0], [1], [0, 0, 1, 1], [], []>, precision = #tpu.contract_precision<fp32>} : vector<16x16xf32>, vector<16x256xf32>, vector<16x256xf32> -> vector<16x256xf32>
      %cst_6 = arith.constant dense<0.000000e+00> : vector<32x256xf32>
      %7 = tpu.matmul %1, %6, %cst_6 {dimension_numbers = #tpu.dot_dimension_numbers<[1], [0], [0], [1], [0, 0, 1, 1], [], []>, precision = #tpu.contract_precision<fp32>} : vector<32x16xf32>, vector<16x256xf32>, vector<32x256xf32> -> vector<32x256xf32>
      %8 = vector.extract_strided_slice %7 {offsets = [0, 0], sizes = [16, 128], strides = [1, 1]} : vector<32x256xf32> to vector<16x128xf32>
      %9 = vector.extract_strided_slice %7 {offsets = [16, 128], sizes = [16, 128], strides = [1, 1]} : vector<32x256xf32> to vector<16x128xf32>
      %10 = arith.addf %8, %9 : vector<16x128xf32>
      %11 = arith.index_cast %arg5 : i32 to index
      %c0_7 = arith.constant 0 : index
      %c0_8 = arith.constant 0 : index
      %12 = vector.load %arg4[%11, %c0_7, %c0_8] : memref<2x16x256xf32, #tpu.memory_space<vmem>>, vector<1x16x128xf32>
      %13 = vector.shape_cast %12 : vector<1x16x128xf32> to vector<16x128xf32>
      %14 = vector.shape_cast %10 : vector<16x128xf32> to vector<1x16x128xf32>
      tpu.vector_store %arg4[%11, %c0_7, %c0_8], %14 {strides = array<i32>} : memref<2x16x256xf32, #tpu.memory_space<vmem>>, vector<1x16x128xf32>,
      %15 = vector.extract_strided_slice %7 {offsets = [0, 128], sizes = [16, 128], strides = [1, 1]} : vector<32x256xf32> to vector<16x128xf32>
      %16 = vector.extract_strided_slice %7 {offsets = [16, 0], sizes = [16, 128], strides = [1, 1]} : vector<32x256xf32> to vector<16x128xf32>
      %17 = arith.subf %15, %16 : vector<16x128xf32>
      %18 = arith.index_cast %arg5 : i32 to index
      %c0_9 = arith.constant 0 : index
      %c128 = arith.constant 128 : index
      %19 = vector.load %arg4[%18, %c0_9, %c128] : memref<2x16x256xf32, #tpu.memory_space<vmem>>, vector<1x16x128xf32>
      %20 = vector.shape_cast %19 : vector<1x16x128xf32> to vector<16x128xf32>
      %21 = vector.shape_cast %17 : vector<16x128xf32> to vector<1x16x128xf32>
      tpu.vector_store %arg4[%18, %c0_9, %c128], %21 {strides = array<i32>} : memref<2x16x256xf32, #tpu.memory_space<vmem>>, vector<1x16x128xf32>,
    }
    %c2_i32_3 = arith.constant 2 : i32
    return
  }
  func.func @transform_0(%arg0: i32) -> (i32, i32, i32) {
    %c0_i32 = arith.constant 0 : i32
    %c0_i32_0 = arith.constant 0 : i32
    %c0_i32_1 = arith.constant 0 : i32
    return %arg0, %c0_i32, %c0_i32_0 : i32, i32, i32
  }
  func.func @transform_1(%arg0: i32) -> (i32, i32) {
    %c0_i32 = arith.constant 0 : i32
    %c0_i32_0 = arith.constant 0 : i32
    %c0_i32_1 = arith.constant 0 : i32
    return %c0_i32, %c0_i32_0 : i32, i32
  }
  func.func @transform_2(%arg0: i32) -> (i32, i32) {
    %c0_i32 = arith.constant 0 : i32
    %c0_i32_0 = arith.constant 0 : i32
    %c0_i32_1 = arith.constant 0 : i32
    return %c0_i32, %c0_i32_0 : i32, i32
  }
  func.func @transform_3(%arg0: i32) -> (i32, i32, i32) {
    %c0_i32 = arith.constant 0 : i32
    %c0_i32_0 = arith.constant 0 : i32
    %c0_i32_1 = arith.constant 0 : i32
    return %arg0, %c0_i32, %c0_i32_0 : i32, i32, i32
  }
}

</mosaic_0001>

<bundles_post_ra>
// kernel: tpu_custom_call.1
= control target key start
LH: loop header
LB: loop body
LE: loop exit
PB: predicated region body
PF: predicated region fallthrough
CT: control target
= control target key end

     0   :  { %8 = vsyncpa [#allocation3], 0  ;;  %s2104_s0 = inlined_call_operand.hbm [shape: f32[8,16,16], index: 0, kind: input, shape index: {}]   ;;  %s2105_s1 = inlined_call_operand.vmem [shape: f32[16,256], index: 1, kind: input, shape index: {}]   ;;  %s2106_s2 = inlined_call_operand.vmem [shape: f32[32,16], index: 2, kind: input, shape index: {}]   ;;  %s2107_s3 = inlined_call_operand.hbm [shape: f32[8,16,256], index: 3, kind: output, shape index: {}]  }
   0x1   :  { %10 = vsyncpa [#allocation3 + $0x1], 0 }
   0x2   :  { %11 = vsyncpa [#allocation4], 0 }
   0x3   :  { %13 = vsyncpa [#allocation4 + $0x1], 0  ;;  %s1727_s12 = smov 0   ;;  %s1729_s13 = smov 0  }
   0x4   :  { %s1731_s14 = smov 0   ;;  %s1733_s15 = smov 0  }
   0x5 LB: > { %s1748_s16 = sadd.s32 4294967295, %s1694_s15   ;;  %s1515_s17 = sadd.s32 4294967294, %s1694_s15   ;;  %s1694_s15 = sphi %s1733_s15, %s2124_s15   ;;  %s1690_s14 = sphi %s1731_s14, %s2123_s14   ;;  %s1686_s13 = sphi %s1729_s13, %s2122_s13   ;;  %s1682_s12 = sphi %s1727_s12, %s2121_s12  }
   0x6   : > { %s1752_s18 = sadd.s32 1, %s1694_s15   ;;  %s26_s19 = sadd.s32 1, %s1690_s14 }
   0x7   : > { %s23_s20 = ssub.s32 %s1694_s15, %s1752_s18  ;;  %p33_p0 = scmp.ne.s32.totalorder %s1690_s14, %s1686_s13 }
   0x8   : > { %p24_p1 = scmp.eq.s32.totalorder %s23_s20, 0  ;;  %p34_p2 = scmp.eq.s32.totalorder %s1694_s15, 0 }
   0x9   : > { %p39_p3 = scmp.ne.s32.totalorder %s1686_s13, %s1682_s12  ;;  %p40_p4 = scmp.eq.s32.totalorder %s1748_s16, 0 }
   0xa   : > { %s1764_s21 = scalar_select %p24_p1, %s1690_s14, %s26_s19  }
   0xb   : > { %p1766_p5 = por %p34_p2, %p33_p0  ;;  %p1770_p6 = por %p40_p4, %p39_p3 }
   0xc   : > { %p105_p7 = scmp.eq.s32.totalorder %s1748_s16, 3  ;;  %p111_p8 = scmp.eq.s32.totalorder %s1515_s17, 3 }
   0xd   : > { %s2112_s23 = scalar_select %p1770_p6, 1, 0 }
   0xe   : > { %p1551_p9 = scmp.lt.s32.totalorder %s1694_s15, 4  ;;  %p1776_p10 = por %p105_p7, %p33_p0 }
   0xf   : > { %p1780_p11 = por %p111_p8, %p39_p3  ;;  %s137_s26 = sand.u32 1, %s1690_s14  }
  0x10   : > { %s2113_s24 = scalar_select %p1776_p10, 1, 0 }
  0x11   : > { %s2114_s25 = scalar_select %p1780_p11, 1, 0 }
  0x12   : > { %s1535_s27 = sshll.u32 %s1694_s15, 9  ;;  %s1518_s28 = sshll.u32 %s137_s26, 5 }
  0x13   : > { %s1789_s4 = scalar_lea.hbm %s2104_s0, %s1535_s27  ;;  %s141_s5 = scalar_lea.vmem [#allocation2], %s1518_s28 }
  0x14   : > { %s149_s6 = sshll.u32 %s141_s5, 4  ;;  %p1793_p12 = pnand %p1551_p9, %p1766_p5  ;;  %s1797_s6 = int_to_ptr.vmem [resolvable:$true] %s149_s6 }
  0x15   : > { %s1799_s8 = scalar_lea.sflag [#allocation3], %s137_s26  ;;  %s1598_s9 = scalar_lea.hbm %s1789_s4, 512 }
  0x16   : > { %p1599_p13 = scmp.ne.s32.totalorder %s1789_s4, %s1598_s9  ;;  %p1600_p0 = pneg %p1793_p12 }
  0x17   : > { %s1603_s17 = scalar_lea.hbm %s2104_s0, 2048  ;;  %p1604_p3 = scmp.lt.s32.totalorder %s1789_s4, %s2104_s0 }
  0x18   : > { %p1601_p1 = pnand %p1600_p0, %p1599_p13  ;;  %p1605_p4 = scmp.lt.s32.totalorder %s1603_s17, %s1598_s9 }
  0x1a   : > { %p1602_p2 = pneg %p1601_p1  ;;  %p1606_p5 = por %p1605_p4, %p1604_p3 }
  0x1c   : > { %p1607_p7 = pnand %p1606_p5, %p1602_p2 }
  0x1e   : > { %1610 = shalt.err (!%p1607_p7)
}
  0x1f   : > { %s1611_s22 = scalar_lea.vmem %s1797_s6, 512  ;;  %s1700_s26 = smov [#allocation2]  }
  0x20   : > { %p1612_p8 = scmp.ne.s32.totalorder %s1797_s6, %s1611_s22  ;;  %s1616_s27 = sshll.u32 %s1700_s26, 4  ;;  %s1617_s27 = int_to_ptr.vmem [resolvable:$false] %s1616_s27 }
  0x21   : > { %s1618_s28 = scalar_lea.vmem %s1617_s27, 1024  ;;  %p1619_p1 = scmp.lt.s32.totalorder %s1797_s6, %s1617_s27 }
  0x22   : > { %p1614_p9 = pnand %p1612_p8, %p1600_p0  ;;  %p1620_p11 = scmp.lt.s32.totalorder %s1618_s28, %s1611_s22 }
  0x24   : > { %p1615_p13 = pneg %p1614_p9  ;;  %p1621_p10 = por %p1620_p11, %p1619_p1 }
  0x26   : > { %p1622_p6 = pnand %p1621_p10, %p1615_p13 }
  0x28   : > { %1625 = shalt.err (!%p1622_p6)
}
  0x29   : > { %s1701_s29 = smov 128   ;;  %s1702_s30 = smov 8  }
  0x2a   : > { %1546 = dma.hbm_to_vmem [thread:$0]  (!%p1793_p12), %s1789_s4, 512, %s1797_s6, %s1799_s8, %s1701_s29, %s1701_s29, %s1702_s30  }
  0x2b   : > { %p1522_p0 = scmp.ge.s32.totalorder %s1694_s15, 1  ;;  %p157_p2 = scmp.lt.s32.totalorder %s1694_s15, 5 }
  0x2d   : > { %p158_p3 = pnand %p1522_p0, %p157_p2 }
  0x2f   : > { %161 = sbr.rel (%p158_p3) target bundleno = 569 (0x239), region = 32 }
  0x34   : > { %s1823_s5 = sand.u32 1, %s1686_s13   ;;  %p2116_p6 = scmp.ne.s32.totalorder %s2112_s23, 0 }
  0x35   : > { %s1523_s9 = sshll.u32 %s1823_s5, 5  ;;  %s164_s10 = scalar_lea.sflag [#allocation3], %s1823_s5 }
  0x36   : > { %s1827_s11 = scalar_lea.vmem [#allocation2], %s1523_s9 }
  0x37   : > { %1673 = dma.done.wait (%p2116_p6), %s164_s10, 512  }
  0x38   : > { %1675 = vsyncadd (%p2116_p6), %s164_s10, 4294966784  ;;  %s1524_s4 = sshll.u32 %s1823_s5, 6  ;;  %v1837_v0 = vld [vmem:[%s2105_s1] sm:$0xff]  ;;  %v1842_v1 = vld [vmem:[%s2105_s1 + $0x8] sm:$0xff]  ;;  %s1876_s8 = smov 0  }
  0x39   : > { %2117 = vst [vmem:[#allocation8_spill] sm:$0xff] %v1837_v0  ;;  %v1847_v2 = vld [vmem:[%s2105_s1 + $0x10] sm:$0xff]  ;;  %v1852_v3 = vld [vmem:[%s2105_s1 + $0x18] sm:$0xff]  ;;  %v1857_v4 = vld [vmem:[%s2106_s2] sm:$0xff]  ;;  %s1874_s7 = scalar_lea.vmem [#allocation5], %s1524_s4 }
  0x3a   : > { %v1862_v5 = vld [vmem:[%s2106_s2 + $0x8] sm:$0xff]  ;;  %v1867_v6 = vld [vmem:[%s2106_s2 + $0x10] sm:$0xff]  ;;  %v1872_v7 = vld [vmem:[%s2106_s2 + $0x18] sm:$0xff] }
  0x3b LB: >> { %v1882_v8 = vand.u32 4294901760, %v1852_v3  ;;  %v1885_v9 = vand.u32 4294901760, %v1847_v2  ;;  %v1888_v10 = vand.u32 4294901760, %v1842_v1  ;;  %v1703_v15 = vmov 0.0   ;;  %s1525_s4 = sshll.u32 %s1698_s8, 4  ;;  %s1536_s19 = sshll.u32 %s1698_s8, 5  ;;  %s1698_s8 = sphi %s1876_s8, %s205_s8  }
  0x3c   : >> { %285 = vmatprep.mubr.f32.mxu0 %v1703_v15  ;;  %vm210_vm0 = vcmask 130048   ;;  %392 = vmatprep.mubr.f32.mxu1 %v1703_v15  ;;  %s207_s17 = scalar_lea.vmem %s1827_s11, %s1525_s4 [#allocation2]  ;;  %s1411_s20 = scalar_lea.vmem %s1874_s7, %s1536_s19 [#allocation5] }
  0x3d   : >> { %246 = vmatprep.subr.mxu0 %v1882_v8  ;;  %v337_v12 = vsub.f32 %v1852_v3, %v1882_v8  ;;  %v1898_v13 = vsub.f32 %v1847_v2, %v1885_v9  ;;  %v1902_v14 = vsub.f32 %v1842_v1, %v1888_v10  ;;  %v208_v20 = vld [vmem:[%s207_s17] sm:$0xff]  ;;  %v209_v21 = vld [vmem:[%s207_s17 + $0x8] sm:$0xff]  ;;  %v758_v55 = vsel %vm210_vm0, %v1857_v4, 0  ;;  %s205_s8 = sadd.s32 1, %s1698_s8  }
  0x3e   : >> { %248 = vmatpush1.msra.mxu0 %v1885_v9  ;;  %v212_v23 = vsel %vm210_vm0, %v208_v20, 0  ;;  %v215_v24 = vsel %vm210_vm0, %v209_v21, 0  ;;  %v1943_v62 = vand.u32 4294901760, %v758_v55  ;;  %p202_p10 = scmp.ge.s32.totalorder %s205_s8, 2  }
  0x3f   : >> { %v338_v17 = vand.u32 4294901760, %v337_v12  ;;  %v344_v18 = vand.u32 4294901760, %v1898_v13  ;;  %250 = vmatprep.subr.mxu0 %v1888_v10  ;;  %v350_v19 = vand.u32 4294901760, %v1902_v14  ;;  %v286_v28 = vand.u32 4294901760, %v212_v23  ;;  %s1538_s22 = sshll.u32 (%p202_p10), %s1748_s16, 10  ;;  %s1433_s28 = sshll.u32 (%p202_p10), %s1874_s7, 4  ;;  %s2062_s28 = int_to_ptr.vmem [resolvable:$true] %s1433_s28 }
  0x40   : >> { %v2118_v0 = vld [vmem:[#allocation8_spill] sm:$0xff]  ;;  %v297_v30 = vand.u32 4294901760, %v215_v24  ;;  %s2059_s27 = scalar_lea.hbm (%p202_p10), %s2107_s3, %s1538_s22  ;;  %s1419_s29 = scalar_lea.sflag (%p202_p10), [#allocation4], %s1823_s5 }
  0x41   : >> { %v1891_v11 = vand.u32 4294901760, %v2118_v0  ;;  %v339_v25 = vsub.f32 %v337_v12, %v338_v17  ;;  %v345_v26 = vsub.f32 %v1898_v13, %v344_v18  ;;  %v351_v27 = vsub.f32 %v1902_v14, %v350_v19  ;;  %s1626_s30 = scalar_lea.vmem (%p202_p10), %s2062_s28, 1024  ;;  %p2119_p12 = scmp.ne.s32.totalorder (%p202_p10), %s2113_s24, 0 }
  0x42   : >> { %v287_v34 = vsub.f32 %v212_v23, %v286_v28  ;;  %v298_v36 = vsub.f32 %v215_v24, %v297_v30  ;;  %v764_v23 = vsel %vm210_vm0, %v1867_v6, 0  ;;  %p1627_p11 = scmp.ne.s32.totalorder (%p202_p10), %s2062_s28, %s1626_s30  ;;  %s1704_s11 = smov (%p202_p10), [#allocation5]  }
  0x43   : >> { %v355_v16 = vsub.f32 %v2118_v0, %v1891_v11  ;;  %252 = vmatpush1.msra.mxu0 %v1891_v11  ;;  %v340_v31 = vand.u32 4294901760, %v339_v25  ;;  %v346_v32 = vand.u32 4294901760, %v345_v26  ;;  %v352_v33 = vand.u32 4294901760, %v351_v27  ;;  %s1630_s9 = sshll.u32 (%p202_p10), %s1704_s11, 4  ;;  %s1631_s9 = int_to_ptr.vmem [resolvable:$false] %s1630_s9 }
  0x44   : >> { %437 = vmatprep.subr.mxu0 %v337_v12  ;;  %v288_v37 = vand.u32 4294901760, %v287_v34  ;;  %v299_v38 = vand.u32 4294901760, %v298_v36  ;;  %p1628_p4 = pnand (%p202_p10), %p1627_p11, %p2119_p12  ;;  %s1632_s16 = scalar_lea.vmem (%p202_p10), %s1631_s9, 2048 }
  0x45   : >> { %v356_v22 = vand.u32 4294901760, %v355_v16  ;;  %341 = vmatprep.subr.mxu1 %v340_v31  ;;  %p1633_p7 = scmp.lt.s32.totalorder (%p202_p10), %s2062_s28, %s1631_s9  ;;  %p1634_p8 = scmp.lt.s32.totalorder (%p202_p10), %s1632_s16, %s1626_s30 }
  0x46   : >> { %347 = vmatpush1.msra.mxu1 %v346_v32  ;;  %v289_v39 = vsub.f32 %v287_v34, %v288_v37  ;;  %v300_v40 = vsub.f32 %v298_v36, %v299_v38  ;;  %v1958_v32 = vand.u32 4294901760, %v764_v23  ;;  %p1629_p5 = pneg (%p202_p10), %p1628_p4 }
  0x47   : >> { %v357_v29 = vsub.f32 %v355_v16, %v356_v22  ;;  %353 = vmatprep.subr.mxu1 %v352_v33  ;;  %p1635_p9 = por (%p202_p10), %p1634_p8, %p1633_p7 }
  0x48   : >> { %v290_v41 = vand.u32 4294901760, %v289_v39  ;;  %v301_v42 = vand.u32 4294901760, %v300_v40 }
  0x49   : >> { %v358_v35 = vand.u32 4294901760, %v357_v29  ;;  %p1636_p13 = pnand (%p202_p10), %p1635_p9, %p1629_p5 }
  0x4a   : >> { %291 = vmatmul.mubr.f32.vlgmr.msra.gmra.mxu0 %v290_v41 }
  0x4b   : >> { %359 = vmatpush1.msra.mxu1 %v358_v35  ;;  %296 = vmatprep.mubr.f32.mxu0 %v1703_v15 }
  0x4c   : >> { %394 = vmatmul.mubr.f32.vlgmr.msra.gmra.mxu1 %v286_v28  ;;  %525 = vmatprep.subr.mxu1 %v1882_v8 }
  0x4d   : >> { %399 = vmatprep.mubr.f32.mxu1 %v1703_v15  ;;  %527 = vmatpush1.msra.mxu1 %v1885_v9 }
  0x4e   : >> { %529 = vmatprep.subr.mxu1 %v1888_v10  ;;  %440 = vmatpush1.msra.mxu0 %v1898_v13 }
  0x4f   : >> { %443 = vmatprep.subr.mxu0 %v1902_v14  ;;  %531 = vmatpush1.msra.mxu1 %v1891_v11 }
  0x50   : >> { %401 = vmatmul.mubr.f32.gmra.mxu1 %v297_v30  ;;  %446 = vmatpush1.msra.mxu0 %v355_v16 }
  0x51   : >> { %302 = vmatmul.mubr.f32.gmra.mxu0 %v301_v42  ;;  %564 = vmatprep.mubr.f32.mxu1 %v1703_v15 }
  0x52   : >> { %479 = vmatprep.mubr.f32.mxu0 %v1703_v15  ;;  %614 = vmatprep.subr.mxu0 %v338_v17 }
  0x53   : >> { %703 = vmatprep.subr.mxu1 %v1882_v8 }
  0x54   : >> { %568 = vmatmul.mubr.f32.vlgmr.msra.gmra.mxu1 %v288_v37 }
  0x55   : >> { %573 = vmatprep.mubr.f32.mxu1 %v1703_v15  ;;  %705 = vmatpush1.msra.mxu1 %v1885_v9  ;;  %v761_v9 = vsel %vm210_vm0, %v1862_v5, 0 }
  0x56   : >> { %482 = vmatmul.mubr.f32.vlgmr.msra.gmra.mxu0 %v287_v34  ;;  %707 = vmatprep.subr.mxu1 %v1888_v10 }
  0x57   : >> { %487 = vmatprep.mubr.f32.mxu0 %v1703_v15  ;;  %618 = vmatpush1.msra.mxu0 %v344_v18  ;;  %v1948_v18 = vsub.f32 %v758_v55, %v1943_v62 }
  0x58   : >> { %577 = vmatmul.mubr.f32.gmra.mxu1 %v299_v38  ;;  %622 = vmatprep.subr.mxu0 %v350_v19  ;;  %v1950_v19 = vand.u32 4294901760, %v761_v9  ;;  %v767_v38 = vsel %vm210_vm0, %v1872_v7, 0 }
  0x59   : >> { %626 = vmatpush1.msra.mxu0 %v356_v22  ;;  %709 = vmatpush1.msra.mxu1 %v1891_v11 }
  0x5a   : >> { %490 = vmatmul.mubr.f32.gmra.mxu0 %v298_v36  ;;  %742 = vmatprep.mubr.f32.mxu1 %v1703_v15  ;;  %v1956_v31 = vsub.f32 %v761_v9, %v1950_v19 }
  0x5b   : >> { %659 = vmatprep.mubr.f32.mxu0 %v1703_v15 }
  0x5c   : >> { %744 = vmatmul.mubr.f32.vlgmr.msra.gmra.mxu1 %v286_v28 }
  0x5d   : >> { %749 = vmatprep.mubr.f32.mxu1 %v1703_v15 }
  0x5e   : >> { %661 = vmatmul.mubr.f32.vlgmr.msra.gmra.mxu0 %v286_v28 }
  0x5f   : >> { %666 = vmatprep.mubr.f32.mxu0 %v1703_v15 }
  0x60   : >> { %751 = vmatmul.mubr.f32.gmra.mxu1 %v297_v30 }
  0x61   : >> { %966 = vmatprep.mubr.f32.mxu1 %v1703_v15 }
  0x62   : >> { %668 = vmatmul.mubr.f32.gmra.mxu0 %v297_v30  ;;  %v840_v30 = vand.u32 4294901760, %v1948_v18 }
  0x63   : >> { %837 = vmatprep.mubr.f32.mxu0 %v1703_v15 }
 0x10a   : >> { %v292_v44 = vpop.f32.mrf.mxu0 }
 0x10c   : >> { %v395_v43 = vpop.f32.mrf.mxu1  ;;  %v294_v46 = vpop.f32.mrf.mxu0 }
 0x10d   : >> { %v396_v54 = vadd.f32 %v395_v43, %v292_v44  ;;  %v841_v43 = vsub.f32 %v1948_v18, %v840_v30  ;;  %v851_v44 = vand.u32 4294901760, %v1956_v31 }
 0x10e   : >> { %v397_v45 = vpop.f32.mrf.mxu1 }
 0x10f   : >> { %v398_v58 = vadd.f32 %v397_v45, %v294_v46  ;;  %v1971_v45 = vsub.f32 %v764_v23, %v1958_v32 }
 0x110   : >> { %v402_v47 = vpop.f32.mrf.mxu1 }
 0x111   : >> { %v303_v48 = vpop.f32.mrf.mxu0  ;;  %v862_v55 = vand.u32 4294901760, %v1971_v45 }
 0x112   : >> { %v404_v49 = vpop.f32.mrf.mxu1  ;;  %v403_v63 = vadd.f32 %v402_v47, %v303_v48 }
 0x113   : >> { %v305_v50 = vpop.f32.mrf.mxu0 }
 0x114   : >> { %v569_v51 = vpop.f32.mrf.mxu1  ;;  %v405_v12 = vadd.f32 %v404_v49, %v305_v50  ;;  %v1978_v49 = vand.u32 4294901760, %v767_v38 }
 0x116   : >> { %v483_v52 = vpop.f32.mrf.mxu0  ;;  %v571_v53 = vpop.f32.mrf.mxu1 }
 0x117   : >> { %v484_v59 = vadd.f32 %v483_v52, %v396_v54  ;;  %v852_v54 = vsub.f32 %v1956_v31, %v851_v44 }
 0x118   : >> { %v485_v56 = vpop.f32.mrf.mxu0  ;;  %v578_v57 = vpop.f32.mrf.mxu1 }
 0x119   : >> { %v486_v8 = vadd.f32 %v485_v56, %v398_v58  ;;  %v570_v13 = vadd.f32 %v569_v51, %v484_v59  ;;  %v1988_v59 = vsub.f32 %v767_v38, %v1978_v49 }
 0x11a   : >> { %v491_v60 = vpop.f32.mrf.mxu0  ;;  %v580_v61 = vpop.f32.mrf.mxu1 }
 0x11b   : >> { %v492_v14 = vadd.f32 %v491_v60, %v403_v63  ;;  %v572_v20 = vadd.f32 %v571_v53, %v486_v8  ;;  %v842_v53 = vand.u32 4294901760, %v841_v43  ;;  %v853_v8 = vand.u32 4294901760, %v852_v54 }
 0x11c   : >> { %v493_v10 = vpop.f32.mrf.mxu0  ;;  %v745_v11 = vpop.f32.mrf.mxu1 }
 0x11d   : >> { %v494_v21 = vadd.f32 %v493_v10, %v405_v12  ;;  %v579_v25 = vadd.f32 %v578_v57, %v492_v14  ;;  %v873_v12 = vand.u32 4294901760, %v1988_v59 }
 0x11e   : >> { %v662_v16 = vpop.f32.mrf.mxu0  ;;  %v747_v17 = vpop.f32.mrf.mxu1 }
 0x11f   : >> { %v663_v22 = vadd.f32 %v662_v16, %v570_v13  ;;  %v581_v33 = vadd.f32 %v580_v61, %v494_v21  ;;  %v874_v21 = vsub.f32 %v1988_v59, %v873_v12 }
 0x120   : >> { %v664_v24 = vpop.f32.mrf.mxu0  ;;  %v752_v29 = vpop.f32.mrf.mxu1 }
 0x121   : >> { %v746_v26 = vadd.f32 %v745_v11, %v663_v22  ;;  %v665_v27 = vadd.f32 %v664_v24, %v572_v20  ;;  %v863_v11 = vsub.f32 %v1971_v45, %v862_v55  ;;  %v875_v23 = vand.u32 4294901760, %v874_v21 }
 0x122   : >> { %v669_v28 = vpop.f32.mrf.mxu0  ;;  %v754_v42 = vpop.f32.mrf.mxu1 }
 0x123   : >> { %v748_v34 = vadd.f32 %v747_v17, %v665_v27  ;;  %v670_v35 = vadd.f32 %v669_v28, %v579_v25  ;;  %v1960_v36 = vand.u32 4294901760, %v746_v26  ;;  %v864_v20 = vand.u32 4294901760, %v863_v11 }
 0x124   : >> { %v671_v37 = vpop.f32.mrf.mxu0 }
 0x125   : >> { %v1964_v39 = vand.u32 4294901760, %v748_v34  ;;  %v753_v40 = vadd.f32 %v752_v29, %v670_v35  ;;  %v672_v41 = vadd.f32 %v671_v37, %v581_v33  ;;  %v929_v50 = vsub.f32 %v746_v26, %v1960_v36 }
 0x127   : >> { %v1974_v46 = vsub.f32 %v748_v34, %v1964_v39  ;;  %v1976_v47 = vand.u32 4294901760, %v753_v40  ;;  %v755_v48 = vadd.f32 %v754_v42, %v672_v41  ;;  %v930_v60 = vand.u32 4294901760, %v929_v50 }
 0x129   : >> { %v917_v51 = vsub.f32 %v753_v40, %v1976_v47  ;;  %v797_v52 = vand.u32 4294901760, %v755_v48  ;;  %v924_v58 = vand.u32 4294901760, %v1974_v46  ;;  %v931_v13 = vsub.f32 %v929_v50, %v930_v60 }
 0x12b   : >> { %v918_v56 = vand.u32 4294901760, %v917_v51  ;;  %v911_v57 = vsub.f32 %v755_v48, %v797_v52  ;;  %798 = vmatprep.subr.mxu0 %v797_v52  ;;  %v925_v10 = vsub.f32 %v1974_v46, %v924_v58  ;;  %v932_v22 = vand.u32 4294901760, %v931_v13 }
 0x12c   : >> { %800 = vmatpush1.msra.mxu0 %v1976_v47 }
 0x12d   : >> { %802 = vmatprep.subr.mxu0 %v1964_v39  ;;  %v912_v61 = vand.u32 4294901760, %v911_v57  ;;  %v919_v63 = vsub.f32 %v917_v51, %v918_v56  ;;  %v926_v17 = vand.u32 4294901760, %v925_v10 }
 0x12e   : >> { %804 = vmatpush1.msra.mxu0 %v1960_v36 }
 0x12f   : >> { %843 = vmatmul.mubr.f32.vlgmr.msra.gmra.mxu0 %v842_v53  ;;  %1025 = vmatprep.subr.mxu0 %v911_v57  ;;  %v913_v9 = vsub.f32 %v911_v57, %v912_v61  ;;  %v920_v16 = vand.u32 4294901760, %v919_v63 }
 0x130   : >> { %1028 = vmatpush1.msra.mxu0 %v917_v51  ;;  %848 = vmatprep.mubr.f32.mxu0 %v1703_v15 }
 0x131   : >> { %1031 = vmatprep.subr.mxu0 %v1974_v46  ;;  %v914_v14 = vand.u32 4294901760, %v913_v9 }
 0x132   : >> { %1034 = vmatpush1.msra.mxu0 %v929_v50 }
 0x133   : >> { %854 = vmatmul.mubr.f32.gmra.mxu0 %v853_v8  ;;  %915 = vmatprep.subr.mxu1 %v914_v14 }
 0x134   : >> { %1236 = vmatprep.subr.mxu0 %v912_v61  ;;  %921 = vmatpush1.msra.mxu1 %v920_v16 }
 0x135   : >> { %927 = vmatprep.subr.mxu1 %v926_v17  ;;  %859 = vmatprep.mubr.f32.mxu0 %v1703_v15 }
 0x136   : >> { %933 = vmatpush1.msra.mxu1 %v932_v22 }
 0x137   : >> { %865 = vmatmul.mubr.f32.gmra.mxu0 %v864_v20  ;;  %968 = vmatmul.mubr.f32.vlgmr.msra.gmra.mxu1 %v1943_v62 }
 0x138   : >> { %1129 = vmatprep.subr.mxu1 %v797_v52  ;;  %870 = vmatprep.mubr.f32.mxu0 %v1703_v15 }
 0x139   : >> { %1131 = vmatpush1.msra.mxu1 %v1976_v47  ;;  %973 = vmatprep.mubr.f32.mxu1 %v1703_v15 }
 0x13a   : >> { %1133 = vmatprep.subr.mxu1 %v1964_v39 }
 0x13b   : >> { %1135 = vmatpush1.msra.mxu1 %v1960_v36  ;;  %876 = vmatmul.mubr.f32.gmra.mxu0 %v875_v23 }
 0x13c   : >> { %975 = vmatmul.mubr.f32.gmra.mxu1 %v1950_v19  ;;  %1339 = vmatprep.subr.mxu1 %v797_v52 }
 0x13d   : >> { %980 = vmatprep.mubr.f32.mxu1 %v1703_v15  ;;  %1067 = vmatprep.mubr.f32.mxu0 %v1703_v15 }
 0x13f   : >> { %1070 = vmatmul.mubr.f32.vlgmr.msra.gmra.mxu0 %v1948_v18 }
 0x140   : >> { %982 = vmatmul.mubr.f32.gmra.mxu1 %v1958_v32  ;;  %1240 = vmatpush1.msra.mxu0 %v918_v56 }
 0x141   : >> { %1244 = vmatprep.subr.mxu0 %v924_v58  ;;  %987 = vmatprep.mubr.f32.mxu1 %v1703_v15 }
 0x142   : >> { %1248 = vmatpush1.msra.mxu0 %v930_v60  ;;  %1075 = vmatprep.mubr.f32.mxu0 %v1703_v15 }
 0x143   : >> { %1078 = vmatmul.mubr.f32.gmra.mxu0 %v1956_v31 }
 0x144   : >> { %989 = vmatmul.mubr.f32.gmra.mxu1 %v1978_v49  ;;  %1083 = vmatprep.mubr.f32.mxu0 %v1703_v15 }
 0x145   : >> { %1168 = vmatprep.mubr.f32.mxu1 %v1703_v15 }
 0x147   : >> { %1086 = vmatmul.mubr.f32.gmra.mxu0 %v1971_v45 }
 0x148   : >> { %1172 = vmatmul.mubr.f32.vlgmr.msra.gmra.mxu1 %v840_v30  ;;  %1091 = vmatprep.mubr.f32.mxu0 %v1703_v15 }
 0x149   : >> { %1341 = vmatpush1.msra.mxu1 %v1976_v47  ;;  %1177 = vmatprep.mubr.f32.mxu1 %v1703_v15 }
 0x14a   : >> { %1343 = vmatprep.subr.mxu1 %v1964_v39 }
 0x14b   : >> { %1345 = vmatpush1.msra.mxu1 %v1960_v36  ;;  %1094 = vmatmul.mubr.f32.gmra.mxu0 %v1988_v59 }
 0x14c   : >> { %1181 = vmatmul.mubr.f32.gmra.mxu1 %v851_v44  ;;  %1281 = vmatprep.mubr.f32.mxu0 %v1703_v15 }
 0x14d   : >> { %1186 = vmatprep.mubr.f32.mxu1 %v1703_v15 }
 0x14f   : >> { %1283 = vmatmul.mubr.f32.vlgmr.msra.gmra.mxu0 %v1943_v62 }
 0x150   : >> { %1190 = vmatmul.mubr.f32.gmra.mxu1 %v862_v55  ;;  %1288 = vmatprep.mubr.f32.mxu0 %v1703_v15 }
 0x151   : >> { %1195 = vmatprep.mubr.f32.mxu1 %v1703_v15 }
 0x153   : >> { %1290 = vmatmul.mubr.f32.gmra.mxu0 %v1950_v19 }
 0x154   : >> { %1199 = vmatmul.mubr.f32.gmra.mxu1 %v873_v12  ;;  %1295 = vmatprep.mubr.f32.mxu0 %v1703_v15 }
 0x155   : >> { %1378 = vmatprep.mubr.f32.mxu1 %v1703_v15 }
 0x157   : >> { %1297 = vmatmul.mubr.f32.gmra.mxu0 %v1958_v32 }
 0x158   : >> { %1380 = vmatmul.mubr.f32.vlgmr.msra.gmra.mxu1 %v1943_v62  ;;  %1302 = vmatprep.mubr.f32.mxu0 %v1703_v15 }
 0x159   : >> { %1385 = vmatprep.mubr.f32.mxu1 %v1703_v15 }
 0x15b   : >> { %1304 = vmatmul.mubr.f32.gmra.mxu0 %v1978_v49 }
 0x15c   : >> { %1387 = vmatmul.mubr.f32.gmra.mxu1 %v1950_v19 }
 0x15d   : >> { %1392 = vmatprep.mubr.f32.mxu1 %v1703_v15 }
 0x160   : >> { %1394 = vmatmul.mubr.f32.gmra.mxu1 %v1958_v32 }
 0x161   : >> { %1399 = vmatprep.mubr.f32.mxu1 %v1703_v15 }
 0x164   : >> { %1401 = vmatmul.mubr.f32.gmra.mxu1 %v1978_v49 }
 0x1ef   : >> { %v844_v18 = vpop.f32.mrf.mxu0 }
 0x1f1   : >> { %v846_v24 = vpop.f32.mrf.mxu0 }
 0x1f3   : >> { %v855_v25 = vpop.f32.mrf.mxu0 }
 0x1f5   : >> { %v857_v62 = vpop.f32.mrf.mxu0 }
 0x1f7   : >> { %v866_v26 = vpop.f32.mrf.mxu0  ;;  %v969_v27 = vpop.f32.mrf.mxu1 }
 0x1f8   : >> { %v970_v60 = vadd.f32 %v969_v27, %v844_v18 }
 0x1f9   : >> { %v868_v28 = vpop.f32.mrf.mxu0  ;;  %v971_v29 = vpop.f32.mrf.mxu1 }
 0x1fa   : >> { %v972_v58 = vadd.f32 %v971_v29, %v846_v24 }
 0x1fb   : >> { %v877_v30 = vpop.f32.mrf.mxu0 }
 0x1fc   : >> { %v976_v31 = vpop.f32.mrf.mxu1 }
 0x1fd   : >> { %v879_v33 = vpop.f32.mrf.mxu0  ;;  %v977_v21 = vadd.f32 %v976_v31, %v855_v25 }
 0x1fe   : >> { %v978_v19 = vpop.f32.mrf.mxu1 }
 0x1ff   : >> { %v1071_v34 = vpop.f32.mrf.mxu0  ;;  %v979_v11 = vadd.f32 %v978_v19, %v857_v62 }
 0x200   : >> { %v983_v35 = vpop.f32.mrf.mxu1  ;;  %v1072_v12 = vadd.f32 %v1071_v34, %v970_v60 }
 0x201   : >> { %v1073_v36 = vpop.f32.mrf.mxu0  ;;  %v984_v59 = vadd.f32 %v983_v35, %v866_v26 }
 0x202   : >> { %v985_v32 = vpop.f32.mrf.mxu1  ;;  %v1074_v9 = vadd.f32 %v1073_v36, %v972_v58 }
 0x203   : >> { %v1079_v37 = vpop.f32.mrf.mxu0  ;;  %v986_v8 = vadd.f32 %v985_v32, %v868_v28 }
 0x204   : >> { %v990_v15 = vpop.f32.mrf.mxu1  ;;  %v1080_v62 = vadd.f32 %v1079_v37, %v977_v21 }
 0x205   : >> { %v1081_v38 = vpop.f32.mrf.mxu0  ;;  %v991_v14 = vadd.f32 %v990_v15, %v877_v30 }
 0x206   : >> { %v992_v39 = vpop.f32.mrf.mxu1  ;;  %v1082_v23 = vadd.f32 %v1081_v38, %v979_v11 }
 0x207   : >> { %v1087_v40 = vpop.f32.mrf.mxu0  ;;  %v993_v22 = vadd.f32 %v992_v39, %v879_v33 }
 0x208   : >> { %v1173_v41 = vpop.f32.mrf.mxu1  ;;  %v1088_v10 = vadd.f32 %v1087_v40, %v984_v59 }
 0x209   : >> { %v1089_v42 = vpop.f32.mrf.mxu0  ;;  %v1174_v0 = vadd.f32 %v1173_v41, %v1072_v12 }
 0x20a   : >> { %v1175_v43 = vpop.f32.mrf.mxu1  ;;  %v1090_v16 = vadd.f32 %v1089_v42, %v986_v8 }
 0x20b   : >> { %v1095_v44 = vpop.f32.mrf.mxu0  ;;  %v1176_v17 = vadd.f32 %v1175_v43, %v1074_v9 }
 0x20c   : >> { %v1182_v45 = vpop.f32.mrf.mxu1  ;;  %v1096_v18 = vadd.f32 %v1095_v44, %v991_v14 }
 0x20d   : >> { %v1097_v46 = vpop.f32.mrf.mxu0  ;;  %v1183_v31 = vadd.f32 %v1182_v45, %v1080_v62 }
 0x20e   : >> { %v1184_v47 = vpop.f32.mrf.mxu1  ;;  %v1098_v19 = vadd.f32 %v1097_v46, %v993_v22 }
 0x20f   : >> { %v1284_v48 = vpop.f32.mrf.mxu0  ;;  %v1185_v34 = vadd.f32 %v1184_v47, %v1082_v23 }
 0x210   : >> { %v1191_v49 = vpop.f32.mrf.mxu1  ;;  %v1285_v35 = vadd.f32 %v1284_v48, %v1174_v0 }
 0x211   : >> { %v1286_v50 = vpop.f32.mrf.mxu0  ;;  %v1192_v20 = vadd.f32 %v1191_v49, %v1088_v10 }
 0x212   : >> { %v1193_v51 = vpop.f32.mrf.mxu1  ;;  %v1287_v29 = vadd.f32 %v1286_v50, %v1176_v17 }
 0x213   : >> { %v1291_v52 = vpop.f32.mrf.mxu0  ;;  %v1194_v27 = vadd.f32 %v1193_v51, %v1090_v16 }
 0x214   : >> { %v1200_v53 = vpop.f32.mrf.mxu1  ;;  %v1292_v49 = vadd.f32 %v1291_v52, %v1183_v31 }
 0x215   : >> { %v1293_v54 = vpop.f32.mrf.mxu0  ;;  %v1201_v36 = vadd.f32 %v1200_v53, %v1096_v18 }
 0x216   : >> { %v1202_v55 = vpop.f32.mrf.mxu1  ;;  %v1294_v38 = vadd.f32 %v1293_v54, %v1185_v34 }
 0x217   : >> { %v1298_v56 = vpop.f32.mrf.mxu0  ;;  %v1203_v33 = vadd.f32 %v1202_v55, %v1098_v19 }
 0x218   : >> { %v1381_v57 = vpop.f32.mrf.mxu1  ;;  %v1299_v28 = vadd.f32 %v1298_v56, %v1192_v20 }
 0x219   : >> { %v1300_v61 = vpop.f32.mrf.mxu0  ;;  %v1382_v41 = vadd.f32 %v1381_v57, %v1285_v35 }
 0x21a   : >> { %v1383_v63 = vpop.f32.mrf.mxu1  ;;  %v1301_v32 = vadd.f32 %v1300_v61, %v1194_v27 }
 0x21b   : >> { %v1305_v24 = vpop.f32.mrf.mxu0  ;;  %v1384_v15 = vadd.f32 %v1383_v63, %v1287_v29 }
 0x21c   : >> { %v1388_v13 = vpop.f32.mrf.mxu1  ;;  %v1306_v42 = vadd.f32 %v1305_v24, %v1201_v36 }
 0x21d   : >> { %v1307_v39 = vpop.f32.mrf.mxu0  ;;  %v1389_v51 = vadd.f32 %v1388_v13, %v1292_v49 }
 0x21e   : >> { %v1390_v26 = vpop.f32.mrf.mxu1  ;;  %v1308_v46 = vadd.f32 %v1307_v39, %v1203_v33 }
 0x21f   : >> { %v1391_v47 = vadd.f32 %v1390_v26, %v1294_v38 }
 0x220   : >> { %v1395_v30 = vpop.f32.mrf.mxu1 }
 0x221   : >> { %v1396_v25 = vadd.f32 %v1395_v30, %v1299_v28 }
 0x222   : >> { %v1397_v40 = vpop.f32.mrf.mxu1 }
 0x223   : >> { %v1414_v43 = vsub.f32 %v1384_v15, %v1396_v25  ;;  %v1398_v44 = vadd.f32 %v1397_v40, %v1301_v32 }
 0x224   : >> { %v1402_v37 = vpop.f32.mrf.mxu1 }
 0x225   : >> { %1416 = vst [vmem:[%s1411_s20 + $0x8] sm:$0xff] %v1414_v43  ;;  %v1407_v0 = vadd.f32 %v1398_v44, %v1382_v41  ;;  %v1403_v48 = vadd.f32 %v1402_v37, %v1306_v42 }
 0x226   : >> { %v1404_v50 = vpop.f32.mrf.mxu1 }
 0x227   : >> { %1412 = vst [vmem:[%s1411_s20] sm:$0xff] %v1407_v0  ;;  %v1415_v45 = vsub.f32 %v1391_v47, %v1403_v48  ;;  %v1405_v53 = vadd.f32 %v1404_v50, %v1308_v46  ;;  %204 = sbr.rel (!%p202_p10) target bundleno = 59 (0x3b), region = 86 }
 0x229   : >> { %1417 = vst [vmem:[%s1411_s20 + $0x18] sm:$0xff] %v1415_v45  ;;  %v1408_v54 = vadd.f32 %v1405_v53, %v1389_v51 }
 0x22b   : >> { %1413 = vst [vmem:[%s1411_s20 + $0x10] sm:$0xff] %v1408_v54 }
 0x22c   : > { %1639 = shalt.err (!%p1636_p13)
}
 0x22d   : > { %s1640_s10 = scalar_lea.hbm %s2059_s27, 1024  ;;  %s1644_s8 = scalar_lea.hbm %s2107_s3, 4096 }
 0x22e   : > { %p1641_p1 = scmp.ne.s32.totalorder %s2059_s27, %s1640_s10  ;;  %p1645_p3 = scmp.lt.s32.totalorder %s2059_s27, %s2107_s3 }
 0x22f   : > { %p1646_p6 = scmp.lt.s32.totalorder %s1644_s8, %s1640_s10 }
 0x230   : > { %p1642_p0 = pnand %p1641_p1, %p2119_p12 }
 0x231   : > { %p1647_p10 = por %p1646_p6, %p1645_p3 }
 0x232   : > { %p1643_p2 = pneg %p1642_p0 }
 0x234   : > { %p1648_p11 = pnand %p1647_p10, %p1643_p2 }
 0x236   : > { %1651 = shalt.err (!%p1648_p11)
}
 0x237   : > { %s1705_s19 = smov 256   ;;  %s1706_s20 = smov 16  }
 0x238   : > { %1541 = dma.vmem_to_hbm [thread:$0]  (%p2119_p12), %s2062_s28, 1024, %s2059_s27, %s1419_s29, %s1705_s19, %s1705_s19, %s1706_s20  }
 0x239 PF: > { %p1552_p4 = scmp.ge.s32.totalorder %s1694_s15, 2  ;;  %s1448_s22 = sand.u32 1, %s1682_s12  }
 0x23a   : > { %p2120_p5 = scmp.ne.s32.totalorder %s2114_s25, 0  ;;  %s1449_s23 = scalar_lea.sflag [#allocation4], %s1448_s22 }
 0x23c   : > { %p1548_p7 = pnand %p1552_p4, %p2120_p5 }
 0x23e   : > { %p1549_p8 = pneg %p1548_p7 }
 0x240   : > { %1677 = dma.done.wait (%p1549_p8), %s1449_s23, 1024  }
 0x241   : > { %1679 = vsyncadd (%p1549_p8), %s1449_s23, 4294966272  ;;  %p16_p9 = scmp.ge.s32.totalorder %s1752_s18, 6   ;;  %s2121_s12 = smov %s1686_s13 }
 0x242   : > { %s2122_s13 = smov %s1690_s14  ;;  %s2123_s14 = smov %s1764_s21 }
 0x243   : > { %s2124_s15 = smov %s1752_s18  ;;  %18 = sbr.rel (!%p16_p9) target bundleno = 5 (0x5), region = 97 }
 0x248   :  { %1454 = vsyncpa [#allocation3], 1 }
 0x249   :  { %1456 = vsyncpa [#allocation3 + $0x1], 1 }
 0x24a   :  { %1457 = vsyncpa [#allocation4], 1 }
 0x24b   :  { %1459 = vsyncpa [#allocation4 + $0x1], 1 }

</bundles_post_ra>
